<compile_context>
chip_gen: v7x
topology: tpu7x:2x2x1
jax: 0.10.0
libtpu: 0.0.40
codegen_flags: <defaults>
</compile_context>

<pallas_src>
import jax
import jax.numpy as jnp
from jax.experimental import pallas as pl
from jax.experimental.pallas import tpu as pltpu


def shared_mtl_kernel(x_ref, w1_ref, b1_ref, w2_ref, b2_ref,
                      wp_ref, bp_ref, wq_ref, bq_ref,
                      phase_ref, pos_ref):
    # Shared trunk: Linear -> ReLU -> Linear -> ReLU (MXU matmuls, f32 accumulation).
    h = jnp.dot(x_ref[...], w1_ref[...], preferred_element_type=jnp.float32) + b1_ref[...]
    h = jnp.maximum(h, 0.0).astype(w2_ref.dtype)   # no-op cast in the default f32 path
    h = jnp.dot(h, w2_ref[...], preferred_element_type=jnp.float32) + b2_ref[...]
    h = jnp.maximum(h, 0.0).astype(wp_ref.dtype)
    # Two small head matmuls.  Each output block's last dim equals the full array dim,
    # so the HBM writeback is unpadded (no 128-lane zero slab).
    phase_ref[...] = (jnp.dot(h, wp_ref[...], preferred_element_type=jnp.float32)
                      + bp_ref[...]).astype(phase_ref.dtype)
    pos_ref[...] = (jnp.dot(h, wq_ref[...], preferred_element_type=jnp.float32)
                    + bq_ref[...]).astype(pos_ref.dtype)


def _choose_batch_tile(B, input_dim, hidden_dim, n_out, *, cap, itemsize,
                       vmem_budget=20 << 20):
    """Pick a batch tile: multiple of 8, fits the VMEM budget, and splits the batch
    into >=2 even grid steps when B >= 16 (so v7x can shard across both TCs).
    Returns (tile, padded_batch)."""
    b8 = -(-B // 8) * 8                                   # round B up to sublane multiple
    row_bytes = (3 * input_dim * itemsize                 # (up to) triple-buffered x tile
                 + 2 * hidden_dim * 4                     # trunk intermediates
                 + 2 * n_out * 4)                         # double-buffered outputs
    max_rows = max(8, (vmem_budget // row_bytes) // 8 * 8)
    tb = min(cap, max_rows, b8)
    if tb >= b8 and b8 >= 16:
        # Batch fits in one tile: split into two even steps instead (megacore).
        tb = -(-(b8 // 2) // 8) * 8
    tb = max(8, (tb // 8) * 8)
    b_full = -(-b8 // tb) * tb
    return tb, b_full


def shared_mtl_forward(x, params, *, batch_tile=4096):
    w1, b1, w2, b2, wp, bp, wq, bq = params
    B, input_dim = x.shape
    hidden_dim = w1.shape[1]
    n_phase = wp.shape[1]
    n_pos = wq.shape[1]
    x_itemsize = jnp.dtype(x.dtype).itemsize

    tb, b_full = _choose_batch_tile(B, input_dim, hidden_dim, n_phase + n_pos,
                                    cap=batch_tile, itemsize=x_itemsize)
    grid_steps = b_full // tb

    # Pad awkward batch sizes up to a multiple of the tile (never one giant tile).
    x_in = x if b_full == B else jnp.pad(x, ((0, b_full - B), (0, 0)))

    # x stream: triple-buffer when the grid is deep enough to benefit.
    if grid_steps >= 3:
        x_spec = pl.BlockSpec((tb, input_dim), lambda i: (i, 0),
                              pipeline_mode=pl.Buffered(3))
    else:
        x_spec = pl.BlockSpec((tb, input_dim), lambda i: (i, 0))

    def rep(a):  # tiny replicated (whole-array) block, resident in VMEM every step
        return pl.BlockSpec(a.shape, lambda i: (0, 0))

    param_bytes = sum(int(p.size) * jnp.dtype(p.dtype).itemsize for p in params)
    vmem_est = ((3 if grid_steps >= 3 else 2) * tb * input_dim * x_itemsize
                + 2 * tb * (n_phase + n_pos) * 4
                + 2 * tb * hidden_dim * 4
                + 2 * param_bytes)
    vmem_limit = int(min(48 << 20, max(16 << 20, 2 * vmem_est)))

    flops = 2 * b_full * (input_dim * hidden_dim + hidden_dim * hidden_dim
                          + hidden_dim * (n_phase + n_pos))
    bytes_accessed = (b_full * input_dim * x_itemsize + param_bytes
                      + b_full * (n_phase + n_pos) * 4)

    phase_out, pos_out = pl.pallas_call(
        shared_mtl_kernel,
        grid=(grid_steps,),
        in_specs=[x_spec,
                  rep(w1), rep(b1), rep(w2), rep(b2),
                  rep(wp), rep(bp), rep(wq), rep(bq)],
        out_specs=(pl.BlockSpec((tb, n_phase), lambda i: (i, 0)),
                   pl.BlockSpec((tb, n_pos), lambda i: (i, 0))),
        out_shape=(jax.ShapeDtypeStruct((b_full, n_phase), jnp.float32),
                   jax.ShapeDtypeStruct((b_full, n_pos), jnp.float32)),
        compiler_params=pltpu.CompilerParams(
            dimension_semantics=("parallel",),
            vmem_limit_bytes=vmem_limit),
        cost_estimate=pl.CostEstimate(
            flops=flops, transcendentals=0, bytes_accessed=bytes_accessed),
    )(x_in, w1, b1, w2, b2, wp, bp, wq, bq)

    if b_full != B:
        phase_out, pos_out = phase_out[:B], pos_out[:B]
    return phase_out, pos_out


def prepare_params_bf16(params):
    """Optional, hoisted out of forward: cast weights to bf16 once at param-load time.
    Only worth it when x itself is bf16 end-to-end (halves the weight/x HBM streams);
    biases stay f32 (added after f32 MXU accumulation).  Avoid on v5e (no bf16 VPU)."""
    w1, b1, w2, b2, wp, bp, wq, bq = params
    c = lambda w: w.astype(jnp.bfloat16)
    return (c(w1), b1, c(w2), b2, c(wp), bp, c(wq), bq)


def init_params(key, input_dim, hidden_dim, num_phase_classes, num_pos_classes):
    """Deterministic init mirroring nn.Linear shapes (stored as [in, out])."""
    ks = jax.random.split(key, 8)

    def linear(kw, kb, fan_in, fan_out):
        bound = 1.0 / jnp.sqrt(fan_in)
        w = jax.random.uniform(kw, (fan_in, fan_out), jnp.float32, -bound, bound)
        b = jax.random.uniform(kb, (1, fan_out), jnp.float32, -bound, bound)
        return w, b

    w1, b1 = linear(ks[0], ks[1], input_dim, hidden_dim)
    w2, b2 = linear(ks[2], ks[3], hidden_dim, hidden_dim)
    wp, bp = linear(ks[4], ks[5], hidden_dim, num_phase_classes)
    wq, bq = linear(ks[6], ks[7], hidden_dim, num_pos_classes)
    return (w1, b1, w2, b2, wp, bp, wq, bq)


def reference_forward(x, params):
    w1, b1, w2, b2, wp, bp, wq, bq = params
    h = jnp.maximum(x @ w1 + b1, 0.0)
    h = jnp.maximum(h @ w2 + b2, 0.0)
    return h @ wp + bp, h @ wq + bq


if __name__ == "__main__":
    # Small shapes consistent with the module's forward.
    B, input_dim, hidden_dim = 8, 16, 32
    num_phase_classes, num_pos_classes = 7, 5

    key = jax.random.PRNGKey(0)
    kx, kp = jax.random.split(key)
    x = jax.random.normal(kx, (B, input_dim), jnp.float32)
    params = init_params(kp, input_dim, hidden_dim, num_phase_classes, num_pos_classes)

    # Single-tile path (grid = (1,), no padding).
    phase_out, pos_out = shared_mtl_forward(x, params)
    jax.block_until_ready((phase_out, pos_out))

    ref_phase, ref_pos = reference_forward(x, params)
    assert phase_out.shape == (B, num_phase_classes)
    assert pos_out.shape == (B, num_pos_classes)
    assert jnp.allclose(phase_out, ref_phase, atol=1e-5, rtol=1e-5)
    assert jnp.allclose(pos_out, ref_pos, atol=1e-5, rtol=1e-5)

    # Awkward batch (67, not a multiple of 8): exercises batch padding, the multi-step
    # "parallel" grid and the Buffered(3) x stream (grid = (5,) with batch_tile=16).
    B2 = 67
    x2 = jax.random.normal(jax.random.PRNGKey(1), (B2, input_dim), jnp.float32)
    phase2, pos2 = shared_mtl_forward(x2, params, batch_tile=16)
    jax.block_until_ready((phase2, pos2))
    ref_phase2, ref_pos2 = reference_forward(x2, params)
    assert phase2.shape == (B2, num_phase_classes)
    assert pos2.shape == (B2, num_pos_classes)
    assert jnp.allclose(phase2, ref_phase2, atol=1e-5, rtol=1e-5)
    assert jnp.allclose(pos2, ref_pos2, atol=1e-5, rtol=1e-5)

    print("KERNEL_OK")
</pallas_src>

<mosaic_0001>
module attributes {stable_mosaic.version = 11 : i64} {
  func.func @shared_mtl_kernel(%arg0: i32, %arg1: memref<8x16xf32, #tpu.memory_space<vmem>>, %arg2: memref<16x32xf32, #tpu.memory_space<vmem>>, %arg3: memref<1x32xf32, #tpu.memory_space<vmem>>, %arg4: memref<32x32xf32, #tpu.memory_space<vmem>>, %arg5: memref<1x32xf32, #tpu.memory_space<vmem>>, %arg6: memref<32x7xf32, #tpu.memory_space<vmem>>, %arg7: memref<1x7xf32, #tpu.memory_space<vmem>>, %arg8: memref<32x5xf32, #tpu.memory_space<vmem>>, %arg9: memref<1x5xf32, #tpu.memory_space<vmem>>, %arg10: memref<8x7xf32, #tpu.memory_space<vmem>>, %arg11: memref<8x5xf32, #tpu.memory_space<vmem>>) attributes {dimension_semantics = [#tpu.dimension_semantics<parallel>], iteration_bounds = array<i64: 1>, scalar_prefetch = 0 : i64, scratch_operands = 0 : i64, tpu.core_type = #tpu.core_type<tc>, window_params = [{transform_indices = @transform_0, window_bounds = array<i64: 8, 16>}, {pipeline_mode = #tpu.pipeline_mode<synchronous>, transform_indices = @transform_1, window_bounds = array<i64: 16, 32>}, {pipeline_mode = #tpu.pipeline_mode<synchronous>, transform_indices = @transform_2, window_bounds = array<i64: 1, 32>}, {pipeline_mode = #tpu.pipeline_mode<synchronous>, transform_indices = @transform_3, window_bounds = array<i64: 32, 32>}, {pipeline_mode = #tpu.pipeline_mode<synchronous>, transform_indices = @transform_4, window_bounds = array<i64: 1, 32>}, {pipeline_mode = #tpu.pipeline_mode<synchronous>, transform_indices = @transform_5, window_bounds = array<i64: 32, 7>}, {pipeline_mode = #tpu.pipeline_mode<synchronous>, transform_indices = @transform_6, window_bounds = array<i64: 1, 7>}, {pipeline_mode = #tpu.pipeline_mode<synchronous>, transform_indices = @transform_7, window_bounds = array<i64: 32, 5>}, {pipeline_mode = #tpu.pipeline_mode<synchronous>, transform_indices = @transform_8, window_bounds = array<i64: 1, 5>}, {transform_indices = @transform_9, window_bounds = array<i64: 8, 7>}, {transform_indices = @transform_10, window_bounds = array<i64: 8, 5>}]} {
    %c0 = arith.constant 0 : index
    %c0_0 = arith.constant 0 : index
    %0 = vector.load %arg1[%c0, %c0_0] : memref<8x16xf32, #tpu.memory_space<vmem>>, vector<8x16xf32>
    %c0_1 = arith.constant 0 : index
    %c0_2 = arith.constant 0 : index
    %1 = vector.load %arg2[%c0_1, %c0_2] : memref<16x32xf32, #tpu.memory_space<vmem>>, vector<16x32xf32>
    %cst = arith.constant dense<0.000000e+00> : vector<8x32xf32>
    %2 = tpu.matmul %0, %1, %cst {dimension_numbers = #tpu.dot_dimension_numbers<[1], [0], [0], [1], [0, 0, 1, 1], [], []>} : vector<8x16xf32>, vector<16x32xf32>, vector<8x32xf32> -> vector<8x32xf32>
    %c0_3 = arith.constant 0 : index
    %c0_4 = arith.constant 0 : index
    %3 = vector.load %arg3[%c0_3, %c0_4] : memref<1x32xf32, #tpu.memory_space<vmem>>, vector<1x32xf32>
    %4 = vector.broadcast %3 : vector<1x32xf32> to vector<8x32xf32>
    %5 = arith.addf %2, %4 : vector<8x32xf32>
    %cst_5 = arith.constant 0.000000e+00 : f32
    %6 = vector.broadcast %cst_5 : f32 to vector<8x32xf32>
    %7 = arith.maximumf %5, %6 : vector<8x32xf32>
    %c0_6 = arith.constant 0 : index
    %c0_7 = arith.constant 0 : index
    %8 = vector.load %arg4[%c0_6, %c0_7] : memref<32x32xf32, #tpu.memory_space<vmem>>, vector<32x32xf32>
    %cst_8 = arith.constant dense<0.000000e+00> : vector<8x32xf32>
    %9 = tpu.matmul %7, %8, %cst_8 {dimension_numbers = #tpu.dot_dimension_numbers<[1], [0], [0], [1], [0, 0, 1, 1], [], []>} : vector<8x32xf32>, vector<32x32xf32>, vector<8x32xf32> -> vector<8x32xf32>
    %c0_9 = arith.constant 0 : index
    %c0_10 = arith.constant 0 : index
    %10 = vector.load %arg5[%c0_9, %c0_10] : memref<1x32xf32, #tpu.memory_space<vmem>>, vector<1x32xf32>
    %11 = vector.broadcast %10 : vector<1x32xf32> to vector<8x32xf32>
    %12 = arith.addf %9, %11 : vector<8x32xf32>
    %cst_11 = arith.constant 0.000000e+00 : f32
    %13 = vector.broadcast %cst_11 : f32 to vector<8x32xf32>
    %14 = arith.maximumf %12, %13 : vector<8x32xf32>
    %c0_12 = arith.constant 0 : index
    %c0_13 = arith.constant 0 : index
    %15 = vector.load %arg6[%c0_12, %c0_13] : memref<32x7xf32, #tpu.memory_space<vmem>>, vector<32x7xf32>
    %cst_14 = arith.constant dense<0.000000e+00> : vector<8x7xf32>
    %16 = tpu.matmul %14, %15, %cst_14 {dimension_numbers = #tpu.dot_dimension_numbers<[1], [0], [0], [1], [0, 0, 1, 1], [], []>} : vector<8x32xf32>, vector<32x7xf32>, vector<8x7xf32> -> vector<8x7xf32>
    %c0_15 = arith.constant 0 : index
    %c0_16 = arith.constant 0 : index
    %17 = vector.load %arg7[%c0_15, %c0_16] : memref<1x7xf32, #tpu.memory_space<vmem>>, vector<1x7xf32>
    %18 = vector.broadcast %17 : vector<1x7xf32> to vector<8x7xf32>
    %19 = arith.addf %16, %18 : vector<8x7xf32>
    %c0_17 = arith.constant 0 : index
    %c0_18 = arith.constant 0 : index
    %20 = vector.load %arg10[%c0_17, %c0_18] : memref<8x7xf32, #tpu.memory_space<vmem>>, vector<8x7xf32>
    tpu.vector_store %arg10[%c0_17, %c0_18], %19 {strides = array<i32>} : memref<8x7xf32, #tpu.memory_space<vmem>>, vector<8x7xf32>,
    %c0_19 = arith.constant 0 : index
    %c0_20 = arith.constant 0 : index
    %21 = vector.load %arg8[%c0_19, %c0_20] : memref<32x5xf32, #tpu.memory_space<vmem>>, vector<32x5xf32>
    %cst_21 = arith.constant dense<0.000000e+00> : vector<8x5xf32>
    %22 = tpu.matmul %14, %21, %cst_21 {dimension_numbers = #tpu.dot_dimension_numbers<[1], [0], [0], [1], [0, 0, 1, 1], [], []>} : vector<8x32xf32>, vector<32x5xf32>, vector<8x5xf32> -> vector<8x5xf32>
    %c0_22 = arith.constant 0 : index
    %c0_23 = arith.constant 0 : index
    %23 = vector.load %arg9[%c0_22, %c0_23] : memref<1x5xf32, #tpu.memory_space<vmem>>, vector<1x5xf32>
    %24 = vector.broadcast %23 : vector<1x5xf32> to vector<8x5xf32>
    %25 = arith.addf %22, %24 : vector<8x5xf32>
    %c0_24 = arith.constant 0 : index
    %c0_25 = arith.constant 0 : index
    %26 = vector.load %arg11[%c0_24, %c0_25] : memref<8x5xf32, #tpu.memory_space<vmem>>, vector<8x5xf32>
    tpu.vector_store %arg11[%c0_24, %c0_25], %25 {strides = array<i32>} : memref<8x5xf32, #tpu.memory_space<vmem>>, vector<8x5xf32>,
    return
  }
  func.func @transform_0(%arg0: i32) -> (i32, i32) {
    %c0_i32 = arith.constant 0 : i32
    %c0_i32_0 = arith.constant 0 : i32
    return %arg0, %c0_i32 : i32, i32
  }
  func.func @transform_1(%arg0: i32) -> (i32, i32) {
    %c0_i32 = arith.constant 0 : i32
    %c0_i32_0 = arith.constant 0 : i32
    %c0_i32_1 = arith.constant 0 : i32
    return %c0_i32, %c0_i32_0 : i32, i32
  }
  func.func @transform_2(%arg0: i32) -> (i32, i32) {
    %c0_i32 = arith.constant 0 : i32
    %c0_i32_0 = arith.constant 0 : i32
    %c0_i32_1 = arith.constant 0 : i32
    return %c0_i32, %c0_i32_0 : i32, i32
  }
  func.func @transform_3(%arg0: i32) -> (i32, i32) {
    %c0_i32 = arith.constant 0 : i32
    %c0_i32_0 = arith.constant 0 : i32
    %c0_i32_1 = arith.constant 0 : i32
    return %c0_i32, %c0_i32_0 : i32, i32
  }
  func.func @transform_4(%arg0: i32) -> (i32, i32) {
    %c0_i32 = arith.constant 0 : i32
    %c0_i32_0 = arith.constant 0 : i32
    %c0_i32_1 = arith.constant 0 : i32
    return %c0_i32, %c0_i32_0 : i32, i32
  }
  func.func @transform_5(%arg0: i32) -> (i32, i32) {
    %c0_i32 = arith.constant 0 : i32
    %c0_i32_0 = arith.constant 0 : i32
    %c0_i32_1 = arith.constant 0 : i32
    return %c0_i32, %c0_i32_0 : i32, i32
  }
  func.func @transform_6(%arg0: i32) -> (i32, i32) {
    %c0_i32 = arith.constant 0 : i32
    %c0_i32_0 = arith.constant 0 : i32
    %c0_i32_1 = arith.constant 0 : i32
    return %c0_i32, %c0_i32_0 : i32, i32
  }
  func.func @transform_7(%arg0: i32) -> (i32, i32) {
    %c0_i32 = arith.constant 0 : i32
    %c0_i32_0 = arith.constant 0 : i32
    %c0_i32_1 = arith.constant 0 : i32
    return %c0_i32, %c0_i32_0 : i32, i32
  }
  func.func @transform_8(%arg0: i32) -> (i32, i32) {
    %c0_i32 = arith.constant 0 : i32
    %c0_i32_0 = arith.constant 0 : i32
    %c0_i32_1 = arith.constant 0 : i32
    return %c0_i32, %c0_i32_0 : i32, i32
  }
  func.func @transform_9(%arg0: i32) -> (i32, i32) {
    %c0_i32 = arith.constant 0 : i32
    %c0_i32_0 = arith.constant 0 : i32
    return %arg0, %c0_i32 : i32, i32
  }
  func.func @transform_10(%arg0: i32) -> (i32, i32) {
    %c0_i32 = arith.constant 0 : i32
    %c0_i32_0 = arith.constant 0 : i32
    return %arg0, %c0_i32 : i32, i32
  }
}

</mosaic_0001>

<bundles_post_ra>
// kernel: tpu_custom_call.1
= control target key start
LH: loop header
LB: loop body
LE: loop exit
PB: predicated region body
PF: predicated region fallthrough
CT: control target
= control target key end

     0   :  { %16 = vsyncpa [#allocation3], 0  ;;  %v544_v2 = vmov 0.0|0.0   ;;  %vm545_vm0 = vmmov 0   ;;  %v546_v4 = vmov 0.0   ;;  %s692_s0 = inlined_call_operand.vmem [shape: f32[8,16], index: 0, kind: input, shape index: {}]   ;;  %s693_s1 = inlined_call_operand.vmem [shape: f32[16,32], index: 1, kind: input, shape index: {}]   ;;  %s694_s2 = inlined_call_operand.vmem [shape: f32[1,32], index: 2, kind: input, shape index: {}]   ;;  %s695_s3 = inlined_call_operand.vmem [shape: f32[32,32], index: 3, kind: input, shape index: {}]   ;;  %s696_s4 = inlined_call_operand.vmem [shape: f32[1,32], index: 4, kind: input, shape index: {}]   ;;  %s697_s5 = inlined_call_operand.vmem [shape: f32[32,7], index: 5, kind: input, shape index: {}]   ;;  %s698_s6 = inlined_call_operand.vmem [shape: f32[1,7], index: 6, kind: input, shape index: {}]   ;;  %s699_s7 = inlined_call_operand.vmem [shape: f32[32,5], index: 7, kind: input, shape index: {}]   ;;  %s700_s8 = inlined_call_operand.vmem [shape: f32[1,5], index: 8, kind: input, shape index: {}]   ;;  %s701_s9 = inlined_call_operand.hbm [shape: f32[8,7], index: 9, kind: output, shape index: {0}]   ;;  %s702_s10 = inlined_call_operand.hbm [shape: f32[8,5], index: 10, kind: output, shape index: {1}]  }
   0x1   :  { %v37_v0 = vld [vmem:[%s693_s1] sm:$0xff]  ;;  %v38_v1 = vld [vmem:[%s693_s1 + $0x8] sm:$0xff]  ;;  %470 = vmatprep.subr.bf16.mxu0 %v544_v2  ;;  %434 = vmatprep.mubr.msk.f32.mxu0 %vm545_vm0, %v546_v4 }
   0x2   :  { %v471_v3 = vpack.c.bf16 %v38_v1, %v37_v0  ;;  %v121_v5 = vld [vmem:[%s695_s3] sm:$0xff]  ;;  %v122_v6 = vld [vmem:[%s695_s3 + $0x8] sm:$0xff]  ;;  %473 = vmatprep.subr.bf16.mxu1 %v544_v2  ;;  %445 = vmatprep.mubr.msk.f32.mxu1 %vm545_vm0, %v546_v4 }
   0x3   :  { %v474_v7 = vpack.c.bf16 %v122_v6, %v121_v5 }
   0x4   :  { %17 = vsyncpa [#allocation5], 0  ;;  %472 = vmatpush3.bf16.msra.mxu0 %v471_v3  ;;  %v36_v8 = vld [vmem:[%s692_s0] sm:$0xff]  ;;  %vm46_vm1 = vcmask 130048   ;;  %v123_v9 = vld [vmem:[%s695_s3 + $0x10] sm:$0xff]  ;;  %vm132_vm2 = vcmask 261120  }
   0x5   :  { %475 = vmatpush3.bf16.msra.mxu1 %v474_v7  ;;  %479 = vmatprep.subr.bf16.mxu0 %v544_v2  ;;  %v124_v10 = vld [vmem:[%s695_s3 + $0x18] sm:$0xff]  ;;  %v207_v12 = vld [vmem:[%s697_s5] sm:$0xff]  ;;  %v208_v13 = vld [vmem:[%s697_s5 + $0x8] sm:$0xff]  ;;  %s547_s24 = smov [#allocation2]   ;;  %s548_s26 = smov [#allocation4]   ;;  %vm291_vm3 = vcmask 56320  }
   0x6   :  { %476 = vmatprep.subr.bf16.mxu1 %v544_v2  ;;  %v477_v11 = vpack.c.bf16 %v124_v10, %v123_v9  ;;  %v480_v14 = vpack.c.bf16 %v208_v13, %v207_v12  ;;  %v404_v15 = vld [vmem:[%s694_s2] ss:$0 sm:$0xff]  ;;  %v294_v17 = vld [vmem:[%s699_s7 + $0x8] sm:$0xff]  ;;  %v209_v23 = vld [vmem:[%s697_s5 + $0x10] sm:$0xff]  ;;  %s382_s25 = sshll.u32 %s547_s24, 4  ;;  %vm374_vm4 = vcmask 39936   ;;  %s383_s25 = int_to_ptr.vmem [resolvable:$true] %s382_s25 }
   0x7   :  { %435 = vmatmul.mubr.msk.f32.vlgmr.msra.gmra.mrb[0].mxu0 %vm46_vm1, %v36_v8  ;;  %v293_v16 = vld [vmem:[%s699_s7] sm:$0xff]  ;;  %v210_v24 = vld [vmem:[%s697_s5 + $0x18] sm:$0xff]  ;;  %v295_v25 = vld [vmem:[%s699_s7 + $0x10] sm:$0xff]  ;;  %p501_p1 = scmp.lt.s32.totalorder %s383_s25, %s383_s25 }
   0x8   :  { %456 = vmatprep.mubr.msk.f32.mxu0 %vm545_vm0, %v546_v4  ;;  %481 = vmatpush3.bf16.msra.mxu0 %v480_v14  ;;  %v486_v21 = vpack.c.bf16 %v294_v17, %v293_v16  ;;  %v483_v26 = vpack.c.bf16 %v210_v24, %v209_v23  ;;  %v296_v27 = vld [vmem:[%s699_s7 + $0x18] sm:$0xff]  ;;  %v406_v29 = vld [vmem:[%s696_s4] ss:$0 sm:$0xff]  ;;  %s392_s4 = sshll.u32 %s548_s26, 4  ;;  %s393_s4 = int_to_ptr.vmem [resolvable:$true] %s392_s4 }
   0x9   :  { %478 = vmatpush3.bf16.msra.mxu1 %v477_v11  ;;  %482 = vmatprep.subr.bf16.mxu0 %v544_v2  ;;  %v489_v28 = vpack.c.bf16 %v296_v27, %v295_v25  ;;  %v408_v34 = vld [vmem:[%s698_s6] ss:$0 sm:$0xff]  ;;  %s496_s6 = scalar_lea.vmem %s383_s25, 128 }
   0xa   :  { %485 = vmatprep.subr.bf16.mxu1 %v544_v2  ;;  %v410_v35 = vld [vmem:[%s700_s8] ss:$0 sm:$0xff]  ;;  %p497_p0 = scmp.ne.s32.totalorder %s383_s25, %s496_s6  ;;  %p502_p2 = scmp.lt.s32.totalorder %s496_s6, %s496_s6 }
   0xc   :  { %484 = vmatpush3.bf16.msra.mxu0 %v483_v26  ;;  %p503_p3 = por %p502_p2, %p501_p1 }
   0xe   :  { %p504_p4 = pnand %p503_p3, %p497_p0 }
  0xda   :  { %v116_v18 = vpop.f32.mrb[0].mxu0 }
  0xdb   :  { %v117_v19 = vadd.f32 %v404_v15, %v116_v18  ;;  %v436_v20 = vpop.f32.mrb[1].mxu0 }
  0xdd   :  { %v120_v22 = vmax.f32 %v117_v19, 0.0 }
  0xdf   :  { %446 = vmatmul.mubr.msk.f32.vlgmr.msra.gmra.mrb[0].mxu1 %vm132_vm2, %v120_v22 }
  0xe0   :  { %487 = vmatpush3.bf16.msra.mxu1 %v486_v21  ;;  %467 = vmatprep.mubr.msk.f32.mxu1 %vm545_vm0, %v546_v4 }
  0xe1   :  { %488 = vmatprep.subr.bf16.mxu1 %v544_v2 }
  0xe4   :  { %490 = vmatpush3.bf16.msra.mxu1 %v489_v28 }
 0x1b2   :  { %v202_v30 = vpop.f32.mrb[0].mxu1 }
 0x1b3   :  { %v203_v31 = vadd.f32 %v406_v29, %v202_v30  ;;  %v447_v32 = vpop.f32.mrb[1].mxu1 }
 0x1b5   :  { %v206_v33 = vmax.f32 %v203_v31, 0.0 }
 0x1b7   :  { %457 = vmatmul.mubr.msk.f32.vlgmr.msra.gmra.mrb[2].mxu0 %vm132_vm2, %v206_v33  ;;  %468 = vmatmul.mubr.msk.f32.vlgmr.msra.gmra.mrb[2].mxu1 %vm132_vm2, %v206_v33 }
 0x28a   :  { %v287_v36 = vpop.f32.mrb[2].mxu0  ;;  %v370_v37 = vpop.f32.mrb[2].mxu1 }
 0x28b   :  { %v288_v38 = vadd.f32 %v408_v34, %v287_v36  ;;  %v371_v39 = vadd.f32 %v410_v35, %v370_v37  ;;  %v458_v40 = vpop.f32.mrb[3].mxu0  ;;  %v469_v41 = vpop.f32.mrb[3].mxu1 }
 0x28d   :  { %292 = vst.msk [vmem:[#allocation2] sm:$0xff] %vm291_vm3, %v288_v38 }
 0x28e   :  { %375 = vst.msk [vmem:[#allocation4] sm:$0xff] %vm374_vm4, %v371_v39 }
 0x28f   :  { %507 = shalt.err (!%p504_p4)
}
 0x290   :  { %s508_s27 = scalar_lea.hbm %s701_s9, 128 }
 0x291   :  { %p509_p5 = scmp.ne.s32.totalorder %s701_s9, %s508_s27  ;;  %p512_p6 = scmp.lt.u32.totalorder %s508_s27, %s701_s9 }
 0x293   :  { %p514_p7 = pnand %p512_p6, %p509_p5 }
 0x295   :  { %517 = shalt.err (!%p514_p7)
}
 0x296   :  { %385 = dma.vmem_to_hbm [thread:$0]  %s383_s25, 128, %s701_s9, [#allocation3]  }
 0x297   :  { %s518_s13 = scalar_lea.vmem %s393_s4, 128  ;;  %p523_p9 = scmp.lt.s32.totalorder %s393_s4, %s393_s4 }
 0x298   :  { %p519_p8 = scmp.ne.s32.totalorder %s393_s4, %s518_s13  ;;  %p524_p10 = scmp.lt.s32.totalorder %s518_s13, %s518_s13 }
 0x29a   :  { %p525_p11 = por %p524_p10, %p523_p9 }
 0x29c   :  { %p526_p12 = pnand %p525_p11, %p519_p8 }
 0x29e   :  { %529 = shalt.err (!%p526_p12)
}
 0x29f   :  { %s530_s15 = scalar_lea.hbm %s702_s10, 128 }
 0x2a0   :  { %p531_p13 = scmp.ne.s32.totalorder %s702_s10, %s530_s15  ;;  %p534_p0 = scmp.lt.u32.totalorder %s530_s15, %s702_s10 }
 0x2a2   :  { %p536_p1 = pnand %p534_p0, %p531_p13 }
 0x2a4   :  { %539 = shalt.err (!%p536_p1)
}
 0x2a5   :  { %395 = dma.vmem_to_hbm [thread:$0]  %s393_s4, 128, %s702_s10, [#allocation5]  }
 0x2a6   :  { %540 = dma.done.wait [#allocation3], 128  }
 0x2a7   :  { %541 = vsyncadd [#allocation3], 4294967168 }
 0x2a8   :  { %542 = dma.done.wait [#allocation5], 128  }
 0x2a9   :  { %543 = vsyncadd [#allocation5], 4294967168 }
 0x2aa   :  { %402 = vsyncpa [#allocation3], 1 }
 0x2ab   :  { %403 = vsyncpa [#allocation5], 1 }

</bundles_post_ra>
